<compile_context>
chip_gen: v5e
topology: v5e:2x2
jax: 0.10.0
libtpu: 0.0.40
codegen_flags: <defaults>
</compile_context>

<pallas_src>
import jax
import jax.numpy as jnp
from jax import lax
from jax.experimental import pallas as pl
from jax.experimental.pallas import tpu as pltpu


# ---------------------------------------------------------------------------
# Kernel A: graph construction (single grid point; all graph math in f32).
# ---------------------------------------------------------------------------
def graph_kernel(xavg_ref, noise_ref, wn_ref):
    """xavg_ref: [N, L] f32 batch-mean node features;
    noise_ref: [N, N] f32 logistic noise (difference of two Gumbel draws);
    wn_ref:   [N, N] bf16 output = gcn-normalized dense edge weights."""
    y = xavg_ref[...]                                   # [N, L]
    n = y.shape[0]

    # --- similarity-based logits init (logits start at zero => init always runs) ---
    nrm2 = jnp.sum(y * y, axis=1, keepdims=True)        # [N, 1]
    yn = y * lax.rsqrt(jnp.maximum(nrm2, 1e-24))        # == F.normalize(p=2, eps=1e-12)
    # sim[m, n] = <yn[m, :], yn[n, :]>   (A @ A.T without materializing the transpose)
    sim = lax.dot_general(yn, yn, (((1,), (1,)), ((), ())),
                          preferred_element_type=jnp.float32)        # [N, N]
    # logits[:,0] = (sim+1)/2, logits[:,1] = 1 - logits[:,0]  =>  logit0 - logit1 = sim.

    # --- hard Gumbel-softmax sampling with a single logistic draw ---
    #   argmax over {logit0 + g0, logit1 + g1}  <=>  logit0 - logit1 >= g1 - g0,
    #   and (g1 - g0) ~ Logistic(0, 1) == noise.
    # TODO(synk): host-generated noise stream differs from torch.gumbel_softmax
    #             (statistically equivalent, not bit-identical).
    A = (sim >= noise_ref[...]).astype(jnp.float32)     # directed 0/1 adjacency

    # fallback to self-loop edges if nothing was sampled
    row_i = lax.broadcasted_iota(jnp.int32, (n, n), 0)
    col_i = lax.broadcasted_iota(jnp.int32, (n, n), 1)
    eye = (row_i == col_i).astype(jnp.float32)
    A = jnp.where(jnp.any(A > 0.5), A, eye)

    # --- structural coefficients ---
    At = A.T                                            # needed for symmetrization
    adj = jnp.clip(A + At, 0.0, 1.0)                    # symmetrized adjacency
    nmask = jnp.clip(adj + eye, 0.0, 1.0)               # neighbor mask incl. self
    # 0/1 operands: bf16 MXU matmul with f32 accumulation is bit-exact here.
    nmask_bf = nmask.astype(jnp.bfloat16)
    cnc = lax.dot_general(nmask_bf, nmask_bf, (((1,), (1,)), ((), ())),
                          preferred_element_type=jnp.float32)        # common-neighbor counts
    valid = jnp.logical_and(adj > 0.0, cnc > 1.0)
    inv_max = 1.0 / jnp.max(cnc)                        # scalar; max >= 1 (diagonal)
    sc = jnp.where(valid, (cnc * inv_max) * cnc, 0.0)   # lambda_val = 1.0

    # per-edge weights only on sampled (directed) edges
    W = A * sc                                          # [N, N]

    # --- gcn_norm (add_self_loops=False): deg[n] = sum over dst-column n.
    # deg_col reuses the exact symmetry of sc so the same degree vector is
    # produced directly in column-vector form (no [1,N] <-> [N,1] relayout).
    deg_row = jnp.sum(W, axis=0, keepdims=True)         # [1, N]  deg[dst]
    deg_col = jnp.sum(At * sc, axis=1, keepdims=True)   # [N, 1]  deg[src] (sc symmetric)
    dinv_row = jnp.where(deg_row > 0.0, lax.rsqrt(deg_row), 0.0)     # inf -> 0
    dinv_col = jnp.where(deg_col > 0.0, lax.rsqrt(deg_col), 0.0)
    wn_ref[...] = (W * dinv_row * dinv_col).astype(wn_ref.dtype)     # bf16 for the MXU


# ---------------------------------------------------------------------------
# Kernel B: batch-blocked aggregation with hoisted per-node linear transform.
# ---------------------------------------------------------------------------
def aggregate_kernel(x_ref, wn_ref, wt_ref, b_ref, o_ref, z_ref):
    """x_ref: [Bsub*L, N] bf16 stacked batch rows (resident across node tiles);
    wn_ref: [N, tn] bf16 Wn column tile; wt_ref: [L, L] bf16 = weight.T;
    b_ref: [Bsub*L, 1] f32 bias rows; o_ref: [Bsub*L, tn] f32;
    z_ref: [Bsub*L, N] bf16 VMEM scratch holding weight^T @ x_b per batch."""
    L = wt_ref.shape[0]
    n_sub = x_ref.shape[0] // L

    @pl.when(pl.program_id(1) == 0)
    def _():
        # Hoisted linear transform: computed once per batch block, reused for
        # every node-column tile (the two matmuls commute).
        for b in range(n_sub):                          # static unroll; n_sub is small
            xb = x_ref[b * L:(b + 1) * L, :]            # [L, N] bf16
            zb = jnp.dot(wt_ref[...], xb, preferred_element_type=jnp.float32)
            z_ref[b * L:(b + 1) * L, :] = zb.astype(z_ref.dtype)

    # single batch-stacked matmul per grid step: [Bsub*L, N] @ [N, tn]
    out = jnp.dot(z_ref[...], wn_ref[...], preferred_element_type=jnp.float32)
    o_ref[...] = out + b_ref[...]                       # bias broadcast over lanes (nodes)


# ---------------------------------------------------------------------------
# Wrapper.
# ---------------------------------------------------------------------------
def graph_embedding_forward(x, weight, bias, key=None):
    """x: [B, seq_len, num_nodes] -> [B, seq_len, num_nodes] (GraphEmbedding fwd)."""
    B, L, N = x.shape
    x = x.astype(jnp.float32)
    if key is None:
        key = jax.random.PRNGKey(0)

    # batch-mean node features for the similarity init (tiny [N, L]; done in XLA)
    x_avg = jnp.mean(x, axis=0).T                       # [N, L]
    # single logistic draw == difference of two Gumbel draws (host-side PRNG)
    noise = jax.random.logistic(key, (N, N), dtype=jnp.float32)

    wn = pl.pallas_call(
        graph_kernel,
        out_shape=jax.ShapeDtypeStruct((N, N), jnp.bfloat16),
        grid=(1,),
        in_specs=[
            pl.BlockSpec((N, L), lambda i: (0, 0)),             # x_avg
            pl.BlockSpec((N, N), lambda i: (0, 0)),             # logistic noise
        ],
        out_specs=pl.BlockSpec((N, N), lambda i: (0, 0)),
        compiler_params=pltpu.CompilerParams(
            dimension_semantics=("arbitrary",),
            vmem_limit_bytes=56 * 1024 * 1024,                  # safe on v7x (64 MiB phys)
        ),
    )(x_avg, noise)

    # bf16 operands for the MXU (f32 accumulation); graph math above stays f32.
    x2d = x.reshape(B * L, N).astype(jnp.bfloat16)      # contiguous -> free reshape
    wt_bf = weight.astype(jnp.bfloat16).T               # pre-transposed -> plain NN matmul
    bias_rows = jnp.tile(bias.astype(jnp.float32).reshape(1, L), (B, 1)).reshape(B * L, 1)

    # node-column tiling: 256-wide tiles fill the v6e/v7x MXUs; 128 otherwise; lane-dense
    if N % 256 == 0:
        tn = 256
    elif N % 128 == 0:
        tn = 128
    else:
        tn = N
    nt = N // tn

    # batch blocking: largest valid batch block whose working set fits a
    # conservative VMEM budget -> Wn streams once per block instead of per batch
    budget = 8 * 1024 * 1024
    valid = [c for c in range(1, B + 1) if B % c == 0 and ((c * L) % 8 == 0 or c == B)]

    def _vmem_need(c):
        rows = c * L
        return (rows * N * 2 * 2          # x block (double-buffered)
                + rows * N * 2            # z scratch
                + rows * tn * 4 * 2       # output tile (double-buffered)
                + N * tn * 2 * 2)         # Wn tile (double-buffered)

    fitting = [c for c in valid if _vmem_need(c) <= budget]
    Bsub = max(fitting) if fitting else min(valid)
    nb = B // Bsub

    out2d = pl.pallas_call(
        aggregate_kernel,
        out_shape=jax.ShapeDtypeStruct((B * L, N), jnp.float32),
        grid=(nb, nt),
        in_specs=[
            pl.BlockSpec((Bsub * L, N), lambda i, j: (i, 0)),   # x rows (resident across j)
            pl.BlockSpec((N, tn), lambda i, j: (0, j)),         # Wn column tile
            pl.BlockSpec((L, L), lambda i, j: (0, 0)),          # weight.T (resident)
            pl.BlockSpec((Bsub * L, 1), lambda i, j: (i, 0)),   # bias rows
        ],
        out_specs=pl.BlockSpec((Bsub * L, tn), lambda i, j: (i, j)),
        scratch_shapes=[pltpu.VMEM((Bsub * L, N), jnp.bfloat16)],
        compiler_params=pltpu.CompilerParams(
            # i is independent (megacore-shardable); j carries the z scratch dep.
            dimension_semantics=("parallel", "arbitrary"),
            vmem_limit_bytes=32 * 1024 * 1024,
        ),
    )(x2d, wn, wt_bf, bias_rows)

    return out2d.reshape(B, L, N)                       # [B, L, N] f32


def init_params(key, seq_len):
    """Deterministic parameter init matching AdaGCNConv.reset_parameters()."""
    fan_in = fan_out = seq_len
    stdv = (6.0 / (fan_in + fan_out)) ** 0.5            # glorot uniform
    weight = jax.random.uniform(key, (seq_len, seq_len), jnp.float32,
                                minval=-stdv, maxval=stdv)
    bias = jnp.zeros((seq_len,), jnp.float32)           # zeros init
    return weight, bias


if __name__ == "__main__":
    B, L, N = 2, 32, 8          # batch, seq_len, num_nodes

    key = jax.random.PRNGKey(0)
    kx, kp, kn = jax.random.split(key, 3)

    x = jax.random.normal(kx, (B, L, N), dtype=jnp.float32)
    weight, bias = init_params(kp, L)

    out = graph_embedding_forward(x, weight, bias, key=kn)
    out = jax.block_until_ready(out)

    assert out.shape == (B, L, N), out.shape
    assert bool(jnp.all(jnp.isfinite(out)))
    print("KERNEL_OK")
</pallas_src>

<mosaic_0001>
module attributes {stable_mosaic.version = 11 : i64} {
  func.func @graph_kernel(%arg0: i32, %arg1: memref<8x32xf32, #tpu.memory_space<vmem>>, %arg2: memref<8x8xf32, #tpu.memory_space<vmem>>, %arg3: memref<8x8xbf16, #tpu.memory_space<vmem>>) attributes {dimension_semantics = [#tpu.dimension_semantics<arbitrary>], iteration_bounds = array<i64: 1>, scalar_prefetch = 0 : i64, scratch_operands = 0 : i64, tpu.core_type = #tpu.core_type<tc>, window_params = [{pipeline_mode = #tpu.pipeline_mode<synchronous>, transform_indices = @transform_0, window_bounds = array<i64: 8, 32>}, {pipeline_mode = #tpu.pipeline_mode<synchronous>, transform_indices = @transform_1, window_bounds = array<i64: 8, 8>}, {pipeline_mode = #tpu.pipeline_mode<synchronous>, transform_indices = @transform_2, window_bounds = array<i64: 8, 8>}]} {
    %c0 = arith.constant 0 : index
    %c0_0 = arith.constant 0 : index
    %0 = vector.load %arg1[%c0, %c0_0] : memref<8x32xf32, #tpu.memory_space<vmem>>, vector<8x32xf32>
    %1 = arith.mulf %0, %0 : vector<8x32xf32>
    %cst = arith.constant dense<0.000000e+00> : vector<8xf32>
    %2 = vector.multi_reduction <add>, %1, %cst [1] : vector<8x32xf32> to vector<8xf32>
    %3 = vector.shape_cast %2 : vector<8xf32> to vector<8x1xf32>
    %cst_1 = arith.constant 1.000000e-24 : f32
    %4 = vector.broadcast %cst_1 : f32 to vector<8x1xf32>
    %5 = arith.maximumf %3, %4 : vector<8x1xf32>
    %6 = math.rsqrt %5 : vector<8x1xf32>
    %7 = vector.broadcast %6 : vector<8x1xf32> to vector<8x32xf32>
    %8 = arith.mulf %0, %7 : vector<8x32xf32>
    %cst_2 = arith.constant dense<0.000000e+00> : vector<8x8xf32>
    %9 = tpu.matmul %8, %8, %cst_2 {dimension_numbers = #tpu.dot_dimension_numbers<[1], [1], [0], [0], [0, 0, 1, 0], [], []>} : vector<8x32xf32>, vector<8x32xf32>, vector<8x8xf32> -> vector<8x8xf32>
    %c0_3 = arith.constant 0 : index
    %c0_4 = arith.constant 0 : index
    %10 = vector.load %arg2[%c0_3, %c0_4] : memref<8x8xf32, #tpu.memory_space<vmem>>, vector<8x8xf32>
    %11 = arith.cmpf oge, %9, %10 : vector<8x8xf32>
    %12 = arith.extui %11 : vector<8x8xi1> to vector<8x8xi32>
    %13 = arith.sitofp %12 : vector<8x8xi32> to vector<8x8xf32>
    %14 = tpu.iota {dimensions = array<i32: 0>} : vector<8x8xi32>
    %15 = tpu.iota {dimensions = array<i32: 1>} : vector<8x8xi32>
    %16 = arith.cmpi eq, %14, %15 : vector<8x8xi32>
    %17 = arith.extui %16 : vector<8x8xi1> to vector<8x8xi32>
    %18 = arith.sitofp %17 : vector<8x8xi32> to vector<8x8xf32>
    %cst_5 = arith.constant 5.000000e-01 : f32
    %19 = vector.broadcast %cst_5 : f32 to vector<8x8xf32>
    %20 = arith.cmpf ogt, %13, %19 : vector<8x8xf32>
    %cst_6 = arith.constant 1.000000e+00 : f32
    %cst_7 = arith.constant 0.000000e+00 : f32
    %21 = vector.broadcast %cst_6 : f32 to vector<8x8xf32>
    %22 = vector.broadcast %cst_7 : f32 to vector<8x8xf32>
    %23 = arith.select %20, %21, %22 : vector<8x8xi1>, vector<8x8xf32>
    %24 = vector.shape_cast %23 : vector<8x8xf32> to vector<1x8x8xf32>
    %cst_8 = arith.constant dense<0xFF800000> : vector<1xf32>
    %25 = vector.multi_reduction <maximumf>, %24, %cst_8 [1, 2] : vector<1x8x8xf32> to vector<1xf32>
    %26 = vector.shape_cast %25 : vector<1xf32> to vector<1x1x1xf32>
    %27 = vector.extract %26[0, 0, 0] : f32 from vector<1x1x1xf32>
    %cst_9 = arith.constant 0.000000e+00 : f32
    %28 = arith.cmpf ogt, %27, %cst_9 : f32
    %29 = arith.select %28, %13, %18 : vector<8x8xf32>
    %30 = tpu.transpose %29, [1, 0] : vector<8x8xf32> -> vector<8x8xf32>
    %31 = arith.addf %29, %30 : vector<8x8xf32>
    %cst_10 = arith.constant 0.000000e+00 : f32
    %cst_11 = arith.constant 1.000000e+00 : f32
    %32 = vector.broadcast %cst_10 : f32 to vector<8x8xf32>
    %33 = arith.maximumf %32, %31 : vector<8x8xf32>
    %34 = vector.broadcast %cst_11 : f32 to vector<8x8xf32>
    %35 = arith.minimumf %34, %33 : vector<8x8xf32>
    %36 = arith.addf %35, %18 : vector<8x8xf32>
    %cst_12 = arith.constant 0.000000e+00 : f32
    %cst_13 = arith.constant 1.000000e+00 : f32
    %37 = vector.broadcast %cst_12 : f32 to vector<8x8xf32>
    %38 = arith.maximumf %37, %36 : vector<8x8xf32>
    %39 = vector.broadcast %cst_13 : f32 to vector<8x8xf32>
    %40 = arith.minimumf %39, %38 : vector<8x8xf32>
    %41 = arith.truncf %40 : vector<8x8xf32> to vector<8x8xbf16>
    %cst_14 = arith.constant dense<0.000000e+00> : vector<8x8xf32>
    %42 = tpu.matmul %41, %41, %cst_14 {dimension_numbers = #tpu.dot_dimension_numbers<[1], [1], [0], [0], [0, 0, 1, 0], [], []>} : vector<8x8xbf16>, vector<8x8xbf16>, vector<8x8xf32> -> vector<8x8xf32>
    %cst_15 = arith.constant 0.000000e+00 : f32
    %43 = vector.broadcast %cst_15 : f32 to vector<8x8xf32>
    %44 = arith.cmpf ogt, %35, %43 : vector<8x8xf32>
    %cst_16 = arith.constant 1.000000e+00 : f32
    %45 = vector.broadcast %cst_16 : f32 to vector<8x8xf32>
    %46 = arith.cmpf ogt, %42, %45 : vector<8x8xf32>
    %47 = arith.andi %44, %46 : vector<8x8xi1>
    %48 = vector.shape_cast %42 : vector<8x8xf32> to vector<1x8x8xf32>
    %cst_17 = arith.constant dense<0xFF800000> : vector<1xf32>
    %49 = vector.multi_reduction <maximumf>, %48, %cst_17 [1, 2] : vector<1x8x8xf32> to vector<1xf32>
    %50 = vector.shape_cast %49 : vector<1xf32> to vector<1x1x1xf32>
    %51 = vector.extract %50[0, 0, 0] : f32 from vector<1x1x1xf32>
    %cst_18 = arith.constant 1.000000e+00 : f32
    %52 = arith.divf %cst_18, %51 : f32
    %53 = vector.broadcast %52 : f32 to vector<8x8xf32>
    %54 = arith.mulf %42, %53 : vector<8x8xf32>
    %55 = arith.mulf %54, %42 : vector<8x8xf32>
    %cst_19 = arith.constant 0.000000e+00 : f32
    %56 = vector.broadcast %cst_19 : f32 to vector<8x8xf32>
    %57 = arith.select %47, %55, %56 : vector<8x8xi1>, vector<8x8xf32>
    %58 = arith.mulf %29, %57 : vector<8x8xf32>
    %cst_20 = arith.constant dense<0.000000e+00> : vector<8xf32>
    %59 = vector.multi_reduction <add>, %58, %cst_20 [0] : vector<8x8xf32> to vector<8xf32>
    %60 = vector.shape_cast %59 : vector<8xf32> to vector<1x8xf32>
    %61 = arith.mulf %30, %57 : vector<8x8xf32>
    %cst_21 = arith.constant dense<0.000000e+00> : vector<8xf32>
    %62 = vector.multi_reduction <add>, %61, %cst_21 [1] : vector<8x8xf32> to vector<8xf32>
    %63 = vector.shape_cast %62 : vector<8xf32> to vector<8x1xf32>
    %cst_22 = arith.constant 0.000000e+00 : f32
    %64 = vector.broadcast %cst_22 : f32 to vector<1x8xf32>
    %65 = arith.cmpf ogt, %60, %64 : vector<1x8xf32>
    %66 = math.rsqrt %60 : vector<1x8xf32>
    %cst_23 = arith.constant 0.000000e+00 : f32
    %67 = vector.broadcast %cst_23 : f32 to vector<1x8xf32>
    %68 = arith.select %65, %66, %67 : vector<1x8xi1>, vector<1x8xf32>
    %cst_24 = arith.constant 0.000000e+00 : f32
    %69 = vector.broadcast %cst_24 : f32 to vector<8x1xf32>
    %70 = arith.cmpf ogt, %63, %69 : vector<8x1xf32>
    %71 = math.rsqrt %63 : vector<8x1xf32>
    %cst_25 = arith.constant 0.000000e+00 : f32
    %72 = vector.broadcast %cst_25 : f32 to vector<8x1xf32>
    %73 = arith.select %70, %71, %72 : vector<8x1xi1>, vector<8x1xf32>
    %74 = vector.broadcast %68 : vector<1x8xf32> to vector<8x8xf32>
    %75 = arith.mulf %58, %74 : vector<8x8xf32>
    %76 = vector.broadcast %73 : vector<8x1xf32> to vector<8x8xf32>
    %77 = arith.mulf %75, %76 : vector<8x8xf32>
    %78 = arith.truncf %77 : vector<8x8xf32> to vector<8x8xbf16>
    %c0_26 = arith.constant 0 : index
    %c0_27 = arith.constant 0 : index
    %79 = vector.load %arg3[%c0_26, %c0_27] : memref<8x8xbf16, #tpu.memory_space<vmem>>, vector<8x8xbf16>
    tpu.vector_store %arg3[%c0_26, %c0_27], %78 {strides = array<i32>} : memref<8x8xbf16, #tpu.memory_space<vmem>>, vector<8x8xbf16>,
    return
  }
  func.func @transform_0(%arg0: i32) -> (i32, i32) {
    %c0_i32 = arith.constant 0 : i32
    %c0_i32_0 = arith.constant 0 : i32
    %c0_i32_1 = arith.constant 0 : i32
    return %c0_i32, %c0_i32_0 : i32, i32
  }
  func.func @transform_1(%arg0: i32) -> (i32, i32) {
    %c0_i32 = arith.constant 0 : i32
    %c0_i32_0 = arith.constant 0 : i32
    %c0_i32_1 = arith.constant 0 : i32
    return %c0_i32, %c0_i32_0 : i32, i32
  }
  func.func @transform_2(%arg0: i32) -> (i32, i32) {
    %c0_i32 = arith.constant 0 : i32
    %c0_i32_0 = arith.constant 0 : i32
    %c0_i32_1 = arith.constant 0 : i32
    return %c0_i32, %c0_i32_0 : i32, i32
  }
}

</mosaic_0001>

<bundles_post_ra>
// kernel: tpu_custom_call.1
= control target key start
LH: loop header
LB: loop body
LE: loop exit
PB: predicated region body
PF: predicated region fallthrough
CT: control target
= control target key end

     0   :  { %7 = vsyncpa [#allocation3], 0  ;;  %s396_s0 = inlined_call_operand.hbm [shape: f32[8,32], index: 0, kind: input, shape index: {}]   ;;  %s397_s1 = inlined_call_operand.hbm [shape: f32[8,8], index: 1, kind: input, shape index: {}]   ;;  %s398_s2 = inlined_call_operand.hbm [shape: bf16[8,8], index: 2, kind: output, shape index: {}]  }
   0x1   :  { %8 = vsyncpa [#allocation6], 0 }
   0x2   :  { %9 = vsyncpa [#allocation4], 0  ;;  %s15_s11 = sshll.u32 %s396_s0, 4  ;;  %s359_s12 = smov [#allocation2]   ;;  %s16_s11 = int_to_ptr.hbm [resolvable:$true] %s15_s11 }
   0x3   :  { %s17_s13 = sshll.u32 %s359_s12, 4  ;;  %s26_s16 = sshll.u32 %s397_s1, 4  ;;  %s18_s13 = int_to_ptr.vmem [resolvable:$true] %s17_s13  ;;  %s27_s16 = int_to_ptr.hbm [resolvable:$true] %s26_s16 }
   0x4   :  { %20 = dma.hbm_to_vmem [thread:$0]  %s16_s11, 128, %s18_s13, [#allocation3]  }
   0x5   :  { %s360_s17 = smov [#allocation5]  }
   0x6   :  { %s28_s18 = sshll.u32 %s360_s17, 4  ;;  %s29_s18 = int_to_ptr.vmem [resolvable:$true] %s28_s18 }
   0x7   :  { %31 = dma.hbm_to_vmem [thread:$0]  %s27_s16, 128, %s29_s18, [#allocation6]  }
   0x8   :  { %353 = dma.done.wait [#allocation3], 128  }
   0x9   :  { %354 = vsyncadd [#allocation3], 4294967168 }
   0xa   :  { %355 = dma.done.wait [#allocation6], 128  }
   0xb   :  { %356 = vsyncadd [#allocation6], 4294967168  ;;  %v41_v0 = vld [vmem:[#allocation2] sm:$0xff]  ;;  %vm43_vm0 = vcmask 261120   ;;  %v82_v13 = vld [vmem:[#allocation5] sm:$0xff]  ;;  %v361_v15 = vmov 0.0   ;;  %v86_v26 = vlaneseq }
   0xc   :  { %v42_v1 = vmul.f32 %v41_v0, %v41_v0  ;;  %vm95_vm5 = vcmask 64512   ;;  %s362_s21 = smov [#allocation7]   ;;  %s247_s25 = sshll.u32 %s398_s2, 4  ;;  %s248_s25 = int_to_ptr.hbm [resolvable:$true] %s247_s25 }
   0xd   :  { %v87_v27 = vshrl.u32 %v86_v26, 7  ;;  %v89_v28 = vand.u32 127, %v86_v26  ;;  %s245_s22 = sshll.u32 %s362_s21, 4  ;;  %s246_s22 = int_to_ptr.vmem [resolvable:$true] %s245_s22 }
   0xe   :  { %v44_v2 = vsel %vm43_vm0, %v42_v1, 0.0 }
   0xf   :  { %45 = vadd.xlane.f32.xlu0 %v44_v2  ;;  %vm90_vm7 = vcmp.eq.s32.totalorder %v87_v27, %v89_v28 }
  0x10   :  { %v261_v29 = vsel %vm90_vm7, 1.0, %v361_v15 }
  0x82   :  { %v46_v3 = vpop.xlane.xlu0 %45 }
  0x83   :  { %v47_v4 = vmax.f32 %v46_v3, 1e-24 }
  0x85   :  { %273 = vrsqrt.f32 %v47_v4  ;;  %vm54_vm2 = vweird.f32 %v47_v4 }
  0x8b   :  { %v274_v5 = vpop.eup %273 }
  0x8c   :  { %v49_v6 = vmul.f32 %v274_v5, %v47_v4  ;;  %vm55_vm1 = vweird.f32 %v274_v5 }
  0x8d   :  { %vm56_vm3 = vmor %vm54_vm2, %vm55_vm1 }
  0x8e   :  { %v50_v7 = vmul.f32 %v274_v5, %v49_v6 }
  0x90   :  { %v51_v8 = vmul.f32 0.5, %v50_v7 }
  0x92   :  { %v52_v9 = vsub.f32 1.5, %v51_v8 }
  0x94   :  { %v53_v10 = vmul.f32 %v274_v5, %v52_v9 }
  0x96   :  { %v57_v11 = vsel %vm56_vm3, %v274_v5, %v53_v10 }
  0x97   :  { %v58_v12 = vmul.f32 %v57_v11, %v41_v0 }
  0x99   :  { %258 = vmatpush.xpose.msk.msra.mxu0 %vm43_vm0, %v58_v12 }
  0x9c   :  { %259 = vmatmul.msk.f32.vlgmr.msra.gmra.mxu0 %vm43_vm0, %v58_v12 }
 0x119   :  { %v79_v14 = vpop.f32.mrf.mxu0 }
 0x11a   :  { %vm83_vm4 = vcmp.ge.f32.partialorder %v79_v14, %v82_v13 }
 0x11b   :  { %v260_v16 = vsel %vm83_vm4, 1.0, %v361_v15 }
 0x11c   :  { %vm93_vm6 = vcmp.gt.f32.partialorder %v260_v16, 0.5 }
 0x11d   :  { %v94_v17 = vsel %vm93_vm6, 1.0, %v361_v15 }
 0x11e   :  { %v96_v18 = vsel %vm95_vm5, %v94_v17, -inf }
 0x11f   :  { %97 = vmax.xlane.f32.xlu0 %v96_v18 }
 0x192   :  { %v98_v19 = vpop.xlane.xlu0 %97 }
 0x193   :  { %v99_v20 = vrot.slane %v98_v19, 4 }
 0x195   :  { %v100_v21 = vmax.f32 %v98_v19, %v99_v20 }
 0x197   :  { %v101_v22 = vrot.slane %v100_v21, 2 }
 0x199   :  { %v102_v23 = vmax.f32 %v100_v21, %v101_v22 }
 0x19b   :  { %v103_v24 = vrot.slane %v102_v23, 1 }
 0x19d   :  { %v104_v25 = vmax.f32 %v102_v23, %v103_v24 }
 0x19f   :  { %263 = vpush %v104_v25 }
 0x1d0   :  { %s264_s0 = spop %263 }
 0x1d1   :  { %p106_p0 = scmp.gt.f32.partialorder %s264_s0, 0.0 }
 0x1d3   :  { %s107_s1 = scalar_select %p106_p0, 1, 0 }
 0x1d5   :  { %v108_v30 = vstv %s107_s1 }
 0x1d6   :  { %vm109_vm8 = vcmp.eq.s32.totalorder %v108_v30, 1 }
 0x1d7   :  { %v110_v31 = vsel %vm109_vm8, %v260_v16, %v261_v29  ;;  %vm238_vm8 = vcmask 60416  }
 0x1d8   :  { %111 = vxpose.xlu1.b32.start.end [1/1] (short) (narrow) %v110_v31, 8 }
 0x27c   :  { %v127_v32 = vpop.trf.xlu1 }
 0x27d   :  { %v143_v33 = vadd.f32 %v127_v32, %v110_v31 }
 0x27f   :  { %v144_v34 = vmax.f32 %v143_v33, 0.0 }
 0x281   :  { %v145_v35 = vmin.f32 %v144_v34, 1.0 }
 0x283   :  { %v146_v36 = vadd.f32 %v261_v29, %v145_v35  ;;  %vm166_vm14 = vcmp.gt.f32.partialorder %v145_v35, 0.0 }
 0x285   :  { %v147_v37 = vmax.f32 %v146_v36, 0.0 }
 0x287   :  { %v148_v38 = vmin.f32 %v147_v37, 1.0 }
 0x289   :  { %v149_v39 = vpack.c.bf16 %v148_v38, %v148_v38 }
 0x28b   :  { %v151_v40 = vsel %vm95_vm5, %v149_v39, 0 }
 0x28c   :  { %160 = vmatpush.bf16.xpose.msra.mxu1 %v151_v40 }
 0x293   :  { %262 = vmatmul.msk.bf16.vlgmr.msra.gmra.mxu1 %vm95_vm5, %v149_v39 }
 0x310   :  { %v162_v41 = vpop.f32.mrf.mxu1 }
 0x311   :  { %v169_v42 = vsel %vm95_vm5, %v162_v41, -inf  ;;  %vm167_vm13 = vcmp.gt.f32.partialorder %v162_v41, 1.0 }
 0x312   :  { %170 = vmax.xlane.f32.xlu1 %v169_v42  ;;  %vm168_vm15 = vmand %vm166_vm14, %vm167_vm13 }
 0x318   :  { %v164_v43 = vpop.f32.mrf.mxu1 }
 0x385   :  { %v171_v44 = vpop.xlane.xlu1 %170 }
 0x386   :  { %v172_v45 = vrot.slane %v171_v44, 4 }
 0x388   :  { %v173_v46 = vmax.f32 %v171_v44, %v172_v45 }
 0x38a   :  { %v174_v47 = vrot.slane %v173_v46, 2 }
 0x38c   :  { %v175_v48 = vmax.f32 %v173_v46, %v174_v47 }
 0x38e   :  { %v176_v49 = vrot.slane %v175_v48, 1 }
 0x390   :  { %v177_v50 = vmax.f32 %v175_v48, %v176_v49 }
 0x392   :  { %265 = vpush %v177_v50 }
 0x3c3   :  { %s266_s19 = spop %265 }
 0x3c4   :  { %v179_v51 = vstv %s266_s19 }
 0x3c5   :  { %275 = vrcp.f32 %v179_v51  ;;  %v191_v55 = vand.u32 2147483648, %v179_v51  ;;  %v189_v57 = vand.u32 2147483647, %v179_v51  ;;  %vm185_vm10 = vweird.f32 %v179_v51 }
 0x3c7   :  { %v192_v59 = vor.u32 1.1754944e-38, %v191_v55  ;;  %vm190_vm12 = vcmp.eq.f32.partialorder %v189_v57, 8.507059e+37 }
 0x3cb   :  { %v276_v52 = vpop.eup %275 }
 0x3cc   :  { %v181_v53 = vmul.f32 %v276_v52, %v179_v51  ;;  %vm186_vm9 = vweird.f32 %v276_v52 }
 0x3cd   :  { %vm187_vm11 = vmor %vm185_vm10, %vm186_vm9 }
 0x3ce   :  { %v182_v54 = vsub.f32 1.0, %v181_v53 }
 0x3d0   :  { %v183_v56 = vmul.f32 %v276_v52, %v182_v54 }
 0x3d2   :  { %v184_v58 = vadd.f32 %v276_v52, %v183_v56 }
 0x3d4   :  { %v188_v60 = vsel %vm187_vm11, %v276_v52, %v184_v58 }
 0x3d5   :  { %v193_v61 = vsel %vm190_vm12, %v192_v59, %v188_v60 }
 0x3d6   :  { %267 = vpush %v193_v61 }
 0x407   :  { %s268_s20 = spop %267 }
 0x408   :  { %v195_v62 = vstv %s268_s20 }
 0x409   :  { %v196_v63 = vmul.f32 %v195_v62, %v162_v41 }
 0x40b   :  { %v197_v0 = vmul.f32 %v196_v63, %v162_v41 }
 0x40d   :  { %v198_v1 = vsel %vm168_vm15, %v197_v0, 0.0 }
 0x40e   :  { %v207_v2 = vmul.f32 %v198_v1, %v127_v32  ;;  %v199_v4 = vmul.f32 %v198_v1, %v110_v31 }
 0x410   :  { %v208_v3 = vsel %vm95_vm5, %v207_v2, 0.0  ;;  %v200_v5 = vsel %vm95_vm5, %v199_v4, 0.0 }
 0x411   :  { %209 = vadd.xlane.f32.xlu2 %v208_v3  ;;  %v201_v6 = vrot.slane %v200_v5, 4 }
 0x413   :  { %v202_v7 = vadd.f32 %v201_v6, %v200_v5 }
 0x415   :  { %v203_v8 = vrot.slane %v202_v7, 2 }
 0x417   :  { %v204_v9 = vadd.f32 %v203_v8, %v202_v7 }
 0x419   :  { %v205_v10 = vrot.slane %v204_v9, 1 }
 0x41b   :  { %v206_v11 = vadd.f32 %v205_v10, %v204_v9 }
 0x41d   :  { %277 = vrsqrt.f32 %v206_v11  ;;  %vm218_vm1 = vweird.f32 %v206_v11  ;;  %vm211_vm3 = vcmp.gt.f32.partialorder %v206_v11, 0.0 }
 0x423   :  { %v278_v12 = vpop.eup %277 }
 0x424   :  { %v213_v13 = vmul.f32 %v278_v12, %v206_v11  ;;  %vm219_vm0 = vweird.f32 %v278_v12 }
 0x425   :  { %vm220_vm2 = vmor %vm218_vm1, %vm219_vm0 }
 0x426   :  { %v214_v14 = vmul.f32 %v278_v12, %v213_v13 }
 0x428   :  { %v215_v15 = vmul.f32 0.5, %v214_v14 }
 0x42a   :  { %v216_v17 = vsub.f32 1.5, %v215_v15 }
 0x42c   :  { %v217_v19 = vmul.f32 %v278_v12, %v216_v17 }
 0x42e   :  { %v221_v22 = vsel %vm220_vm2, %v278_v12, %v217_v19 }
 0x42f   :  { %v222_v25 = vsel %vm211_vm3, %v221_v22, 0.0 }
 0x430   :  { %v235_v27 = vmul.f32 %v222_v25, %v199_v4 }
 0x484   :  { %v210_v16 = vpop.xlane.xlu2 %209 }
 0x485   :  { %279 = vrsqrt.f32 %v210_v16  ;;  %vm230_vm5 = vweird.f32 %v210_v16  ;;  %vm223_vm7 = vcmp.gt.f32.partialorder %v210_v16, 0.0 }
 0x48b   :  { %v280_v18 = vpop.eup %279 }
 0x48c   :  { %v225_v20 = vmul.f32 %v280_v18, %v210_v16  ;;  %vm231_vm4 = vweird.f32 %v280_v18 }
 0x48d   :  { %vm232_vm6 = vmor %vm230_vm5, %vm231_vm4 }
 0x48e   :  { %v226_v21 = vmul.f32 %v280_v18, %v225_v20 }
 0x490   :  { %v227_v23 = vmul.f32 0.5, %v226_v21 }
 0x492   :  { %v228_v24 = vsub.f32 1.5, %v227_v23 }
 0x494   :  { %v229_v26 = vmul.f32 %v280_v18, %v228_v24 }
 0x496   :  { %v233_v28 = vsel %vm232_vm6, %v280_v18, %v229_v26 }
 0x497   :  { %v234_v29 = vsel %vm223_vm7, %v233_v28, 0.0 }
 0x498   :  { %v236_v30 = vmul.f32 %v235_v27, %v234_v29 }
 0x49a   :  { %v237_v31 = vpack.c.bf16 %v236_v30, %v236_v30 }
 0x49c   :  { %239 = vst.msk [vmem:[#allocation7] sm:$0xf] %vm238_vm8, %v237_v31 }
 0x49d   :  { %250 = dma.vmem_to_hbm [thread:$0]  %s246_s22, 64, %s248_s25, [#allocation4]  }
 0x49e   :  { %357 = dma.done.wait [#allocation4], 64  }
 0x49f   :  { %358 = vsyncadd [#allocation4], 4294967232 }
 0x4a0   :  { %255 = vsyncpa [#allocation3], 1 }
 0x4a1   :  { %256 = vsyncpa [#allocation6], 1 }
 0x4a2   :  { %257 = vsyncpa [#allocation4], 1 }

</bundles_post_ra>
